<compile_context>
chip_gen: v7x
topology: tpu7x:2x2x1
jax: 0.10.0
libtpu: 0.0.40
codegen_flags: <defaults>
</compile_context>

<pallas_src>
import functools
import math

import jax
import jax.numpy as jnp
from jax.experimental import pallas as pl
from jax.experimental.pallas import tpu as pltpu


def _round_up(x, m):
    return ((x + m - 1) // m) * m


def _xlogx(v):
    return v * math.log(v) if v > 0.0 else 0.0


def _label_smoothing_kernel(x_ref, tgt_ref, out_ref, *,
                            block_c, padding_idx, confidence, fill, row_entropy):
    """One (TB, TC) tile of the streaming KL(label-smoothed || x) reduction."""
    j = pl.program_id(1)                               # class-axis step (reduction axis)

    x = x_ref[...].astype(jnp.float32)                 # (TB, TC) log-probs, f32 accumulate
    tgt = tgt_ref[...]                                 # (TB, 1) int32 labels
    tb, tc = x.shape

    nonpad = (tgt != padding_idx).astype(jnp.float32)  # (TB, 1) 1.0 for real rows

    @pl.when(j == 0)
    def _init():
        # Constant entropy term  n_nonpad_rows * sum_c td*log(td)  added once per row block.
        out_ref[0, 0] = jnp.sum(nonpad) * row_entropy

    # Global column indices for this class tile (iota offset by the grid position).
    cols = j * block_c + jax.lax.broadcasted_iota(jnp.int32, (tb, tc), 1)
    is_tgt = cols == tgt                               # target column (if in this tile)
    is_pad_col = cols == padding_idx                   # padding column (if in this tile)

    rowsum = jnp.sum(x, axis=1, keepdims=True)                          # (TB, 1)
    x_tgt = jnp.sum(jnp.where(is_tgt, x, 0.0), axis=1, keepdims=True)   # (TB, 1)
    x_pad = jnp.sum(jnp.where(is_pad_col, x, 0.0), axis=1, keepdims=True)

    # Cross term  sum_c td * x  for this tile's columns, masked to non-padding rows.
    cross = confidence * x_tgt + fill * (rowsum - x_tgt - x_pad)        # (TB, 1)
    out_ref[0, 0] -= jnp.sum(nonpad * cross)


def label_smoothing_loss(x, target, *, size, padding_idx, smoothing,
                         block_b=512, block_c=2048):
    """Pallas equivalent of LabelSmoothing.forward(x, target) -> scalar loss.

    x:      [batch, num_classes] log-probabilities (f32 or bf16)
    target: [batch] integer labels
    """
    B, C = x.shape
    assert C == size, f"x.shape[1]={C} must equal size={size}"

    confidence = 1.0 - smoothing
    fill = smoothing / (size - 2)
    # Compile-time constant: per-row sum of td*log(td) for a non-padding row.
    row_entropy = _xlogx(confidence) + (size - 2) * _xlogx(fill)

    # Lane-dense, (8,128)-aligned tiles; shrink to the (padded) problem if smaller.
    tc = min(block_c, _round_up(C, 128))
    tb = min(block_b, _round_up(B, 8))
    c_pad = _round_up(C, tc)
    b_pad = _round_up(B, tb)

    xp = x
    if (b_pad, c_pad) != (B, C):
        # Zero-padded columns/rows contribute exactly 0 (x=0 * fill, rows masked below).
        xp = jnp.pad(x, ((0, b_pad - B), (0, c_pad - C)))
    tgt = target.astype(jnp.int32).reshape(B, 1)
    if b_pad != B:
        tgt = jnp.pad(tgt, ((0, b_pad - B), (0, 0)), constant_values=padding_idx)

    grid = (b_pad // tb, c_pad // tc)
    n_row_blocks = grid[0]

    kernel = functools.partial(
        _label_smoothing_kernel,
        block_c=tc,
        padding_idx=padding_idx,
        confidence=float(confidence),
        fill=float(fill),
        row_entropy=float(row_entropy),
    )

    itemsize = jnp.dtype(xp.dtype).itemsize
    # Double-buffered x tile + tgt tile + headroom; keep an explicit budget so tile
    # sizing does not silently regress across the 128 MiB (v5e/v6e) vs 64 MiB (v7x) gens.
    vmem_limit = int(min(96 * 2**20,
                         max(32 * 2**20, 4 * tb * tc * itemsize + (1 << 20))))

    partials = pl.pallas_call(
        kernel,
        out_shape=jax.ShapeDtypeStruct((n_row_blocks, 1), jnp.float32),
        grid_spec=pltpu.PrefetchScalarGridSpec(
            num_scalar_prefetch=0,
            grid=grid,
            in_specs=[
                pl.BlockSpec((tb, tc), lambda i, j: (i, j)),   # x tile
                pl.BlockSpec((tb, 1), lambda i, j: (i, 0)),    # target column (row block)
            ],
            out_specs=pl.BlockSpec((1, 1), lambda i, j: (i, 0),
                                   memory_space=pltpu.MemorySpace.SMEM),
        ),
        compiler_params=pltpu.CompilerParams(
            dimension_semantics=("parallel", "arbitrary"),
            vmem_limit_bytes=vmem_limit,
        ),
        cost_estimate=pl.CostEstimate(
            flops=6 * b_pad * c_pad,
            transcendentals=0,
            bytes_accessed=b_pad * c_pad * itemsize + b_pad * 4 + n_row_blocks * 4,
        ),
    )(xp, tgt)

    return jnp.sum(partials)


def _reference_loss(x, target, *, size, padding_idx, smoothing):
    """Pure-JAX reference mirroring the PyTorch module."""
    B, C = x.shape
    x = x.astype(jnp.float32)
    confidence = 1.0 - smoothing
    fill = smoothing / (size - 2)
    cols = jnp.arange(C)[None, :]
    tgt = target[:, None]
    td = jnp.full((B, C), fill, jnp.float32)
    td = jnp.where(cols == tgt, confidence, td)
    td = jnp.where(cols == padding_idx, 0.0, td)
    td = jnp.where(tgt == padding_idx, 0.0, td)
    nz = td > 0
    return jnp.sum(jnp.where(nz, td * (jnp.log(jnp.where(nz, td, 1.0)) - x), 0.0))


if __name__ == "__main__":
    key = jax.random.PRNGKey(0)

    # ---- Test 1: tiny single-block case (f32) --------------------------------
    SIZE1, PAD1, SM1, B1 = 16, 0, 0.1, 8
    k1, k2, k3, k4 = jax.random.split(key, 4)
    x1 = jax.nn.log_softmax(jax.random.normal(k1, (B1, SIZE1), jnp.float32), axis=-1)
    t1 = jax.random.randint(k2, (B1,), 1, SIZE1, dtype=jnp.int32).at[0].set(PAD1)

    loss1 = jax.block_until_ready(
        label_smoothing_loss(x1, t1, size=SIZE1, padding_idx=PAD1, smoothing=SM1))
    ref1 = _reference_loss(x1, t1, size=SIZE1, padding_idx=PAD1, smoothing=SM1)
    assert jnp.allclose(loss1, ref1, rtol=1e-5, atol=1e-4), (loss1, ref1)

    # ---- Test 2: multi-block grid, column/row padding, bf16 pass-through -----
    SIZE2, PAD2, SM2, B2 = 300, 0, 0.1, 24
    x2 = jax.nn.log_softmax(jax.random.normal(k3, (B2, SIZE2), jnp.float32), axis=-1)
    x2 = x2.astype(jnp.bfloat16)                      # bf16 on the wire, f32 in-kernel
    t2 = jax.random.randint(k4, (B2,), 1, SIZE2, dtype=jnp.int32)
    t2 = t2.at[3].set(PAD2).at[17].set(PAD2)          # some padding rows

    loss2 = jax.block_until_ready(
        label_smoothing_loss(x2, t2, size=SIZE2, padding_idx=PAD2, smoothing=SM2,
                             block_b=8, block_c=128))  # grid = (3, 3)
    ref2 = _reference_loss(x2, t2, size=SIZE2, padding_idx=PAD2, smoothing=SM2)
    assert jnp.allclose(loss2, ref2, rtol=1e-3, atol=1e-2), (loss2, ref2)

    print("KERNEL_OK")
</pallas_src>

<mosaic_0001>
module attributes {stable_mosaic.version = 11 : i64} {
  func.func @_label_smoothing_kernel(%arg0: i32, %arg1: i32, %arg2: memref<8x128xf32, #tpu.memory_space<vmem>>, %arg3: memref<8x1xi32, #tpu.memory_space<vmem>>, %arg4: memref<1x1xf32, #tpu.memory_space<smem>>) attributes {dimension_semantics = [#tpu.dimension_semantics<parallel>, #tpu.dimension_semantics<arbitrary>], iteration_bounds = array<i64: 1, 1>, scalar_prefetch = 0 : i64, scratch_operands = 0 : i64, tpu.core_type = #tpu.core_type<tc>, window_params = [{transform_indices = @transform_0, window_bounds = array<i64: 8, 128>}, {transform_indices = @transform_1, window_bounds = array<i64: 8, 1>}, {transform_indices = @transform_2, window_bounds = array<i64: 1, 1>}]} {
    %c0 = arith.constant 0 : index
    %c0_0 = arith.constant 0 : index
    %0 = vector.load %arg2[%c0, %c0_0] : memref<8x128xf32, #tpu.memory_space<vmem>>, vector<8x128xf32>
    %c0_1 = arith.constant 0 : index
    %c0_2 = arith.constant 0 : index
    %1 = vector.load %arg3[%c0_1, %c0_2] : memref<8x1xi32, #tpu.memory_space<vmem>>, vector<8x1xi32>
    %c0_i32 = arith.constant 0 : i32
    %2 = vector.broadcast %c0_i32 : i32 to vector<8x1xi32>
    %3 = arith.cmpi ne, %1, %2 : vector<8x1xi32>
    %4 = arith.extui %3 : vector<8x1xi1> to vector<8x1xi32>
    %5 = arith.sitofp %4 : vector<8x1xi32> to vector<8x1xf32>
    %c0_i32_3 = arith.constant 0 : i32
    %6 = arith.cmpi eq, %arg1, %c0_i32_3 : i32
    %7 = arith.extui %6 : i1 to i32
    %c0_i32_4 = arith.constant 0 : i32
    %8 = arith.cmpi ne, %7, %c0_i32_4 : i32
    scf.if %8 {
      %42 = vector.shape_cast %5 : vector<8x1xf32> to vector<1x8x1xf32>
      %cst_17 = arith.constant dense<0.000000e+00> : vector<1xf32>
      %43 = vector.multi_reduction <add>, %42, %cst_17 [1, 2] : vector<1x8x1xf32> to vector<1xf32>
      %44 = vector.shape_cast %43 : vector<1xf32> to vector<1x1x1xf32>
      %45 = vector.extract %44[0, 0, 0] : f32 from vector<1x1x1xf32>
      %cst_18 = arith.constant -0.588988721 : f32
      %46 = arith.mulf %45, %cst_18 : f32
      %c0_19 = arith.constant 0 : index
      %c0_20 = arith.constant 0 : index
      %47 = memref.load %arg4[%c0_19, %c0_20] : memref<1x1xf32, #tpu.memory_space<smem>>
      memref.store %46, %arg4[%c0_19, %c0_20] : memref<1x1xf32, #tpu.memory_space<smem>>
    } else {
    }
    %c128_i32 = arith.constant 128 : i32
    %9 = arith.muli %arg1, %c128_i32 : i32
    %10 = tpu.iota {dimensions = array<i32: 1>} : vector<8x128xi32>
    %11 = vector.broadcast %9 : i32 to vector<8x128xi32>
    %12 = arith.addi %11, %10 : vector<8x128xi32>
    %13 = vector.broadcast %1 : vector<8x1xi32> to vector<8x128xi32>
    %14 = arith.cmpi eq, %12, %13 : vector<8x128xi32>
    %c0_i32_5 = arith.constant 0 : i32
    %15 = vector.broadcast %c0_i32_5 : i32 to vector<8x128xi32>
    %16 = arith.cmpi eq, %12, %15 : vector<8x128xi32>
    %cst = arith.constant dense<0.000000e+00> : vector<8xf32>
    %17 = vector.multi_reduction <add>, %0, %cst [1] : vector<8x128xf32> to vector<8xf32>
    %18 = vector.shape_cast %17 : vector<8xf32> to vector<8x1xf32>
    %cst_6 = arith.constant 0.000000e+00 : f32
    %19 = vector.broadcast %cst_6 : f32 to vector<8x128xf32>
    %20 = arith.select %14, %0, %19 : vector<8x128xi1>, vector<8x128xf32>
    %cst_7 = arith.constant dense<0.000000e+00> : vector<8xf32>
    %21 = vector.multi_reduction <add>, %20, %cst_7 [1] : vector<8x128xf32> to vector<8xf32>
    %22 = vector.shape_cast %21 : vector<8xf32> to vector<8x1xf32>
    %cst_8 = arith.constant 0.000000e+00 : f32
    %23 = vector.broadcast %cst_8 : f32 to vector<8x128xf32>
    %24 = arith.select %16, %0, %23 : vector<8x128xi1>, vector<8x128xf32>
    %cst_9 = arith.constant dense<0.000000e+00> : vector<8xf32>
    %25 = vector.multi_reduction <add>, %24, %cst_9 [1] : vector<8x128xf32> to vector<8xf32>
    %26 = vector.shape_cast %25 : vector<8xf32> to vector<8x1xf32>
    %cst_10 = arith.constant 0.899999976 : f32
    %27 = vector.broadcast %cst_10 : f32 to vector<8x1xf32>
    %28 = arith.mulf %27, %22 : vector<8x1xf32>
    %29 = arith.subf %18, %22 : vector<8x1xf32>
    %30 = arith.subf %29, %26 : vector<8x1xf32>
    %cst_11 = arith.constant 0.00714285718 : f32
    %31 = vector.broadcast %cst_11 : f32 to vector<8x1xf32>
    %32 = arith.mulf %31, %30 : vector<8x1xf32>
    %33 = arith.addf %28, %32 : vector<8x1xf32>
    %c0_12 = arith.constant 0 : index
    %c0_13 = arith.constant 0 : index
    %34 = memref.load %arg4[%c0_12, %c0_13] : memref<1x1xf32, #tpu.memory_space<smem>>
    %35 = arith.mulf %5, %33 : vector<8x1xf32>
    %36 = vector.shape_cast %35 : vector<8x1xf32> to vector<1x8x1xf32>
    %cst_14 = arith.constant dense<0.000000e+00> : vector<1xf32>
    %37 = vector.multi_reduction <add>, %36, %cst_14 [1, 2] : vector<1x8x1xf32> to vector<1xf32>
    %38 = vector.shape_cast %37 : vector<1xf32> to vector<1x1x1xf32>
    %39 = vector.extract %38[0, 0, 0] : f32 from vector<1x1x1xf32>
    %40 = arith.subf %34, %39 : f32
    %c0_15 = arith.constant 0 : index
    %c0_16 = arith.constant 0 : index
    %41 = memref.load %arg4[%c0_15, %c0_16] : memref<1x1xf32, #tpu.memory_space<smem>>
    memref.store %40, %arg4[%c0_15, %c0_16] : memref<1x1xf32, #tpu.memory_space<smem>>
    return
  }
  func.func @transform_0(%arg0: i32, %arg1: i32) -> (i32, i32) {
    %c0_i32 = arith.constant 0 : i32
    return %arg0, %arg1 : i32, i32
  }
  func.func @transform_1(%arg0: i32, %arg1: i32) -> (i32, i32) {
    %c0_i32 = arith.constant 0 : i32
    %c0_i32_0 = arith.constant 0 : i32
    return %arg0, %c0_i32 : i32, i32
  }
  func.func @transform_2(%arg0: i32, %arg1: i32) -> (i32, i32) {
    %c0_i32 = arith.constant 0 : i32
    %c0_i32_0 = arith.constant 0 : i32
    return %arg0, %c0_i32 : i32, i32
  }
}

</mosaic_0001>

<bundles_post_ra>
// kernel: tpu_custom_call.1
= control target key start
LH: loop header
LB: loop body
LE: loop exit
PB: predicated region body
PF: predicated region fallthrough
CT: control target
= control target key end

     0   :  { %s146_s0 = inlined_call_operand.vmem [shape: f32[8,128], index: 0, kind: input, shape index: {}]   ;;  %s147_s1 = inlined_call_operand.vmem [shape: s32[8,1], index: 1, kind: input, shape index: {}]   ;;  %s148_s2 = inlined_call_operand.hbm [shape: f32[1,1], index: 2, kind: output, shape index: {}]  }
   0x1   :  { %v13_v0 = vld [vmem:[%s147_s1] sm:$0xff] }
   0x2   :  { %7 = vsyncpa [#allocation3], 0  ;;  %v108_v1 = vmov 0   ;;  %v12_v2 = vld [vmem:[%s146_s0] sm:$0xff]  ;;  %v36_v3 = vlaneseq  ;;  %vm14_vm2 = vcmp.ne.s32.totalorder %v13_v0, 0  ;;  %v109_v8 = vmov 0.0  }
   0x3   :  { %95 = vset.pattern.permute.xlu0 %v108_v1  ;;  %v87_v9 = vsel %vm14_vm2, 1.0, %v109_v8  ;;  %vm21_vm3 = vcmask 7168   ;;  %s96_s17 = scalar_lea.hbm %s148_s2, 16 }
   0x4   :  { %41 = vperm.xlu0 %95, %v13_v0   ;;  %v37_v4 = vand.u32 127, %v36_v3  ;;  %v22_v10 = vsel %vm21_vm3, %v87_v9, 0.0  ;;  %p97_p0 = scmp.ne.s32.totalorder %s148_s2, %s96_s17  ;;  %p100_p1 = scmp.lt.u32.totalorder %s96_s17, %s148_s2 }
   0x6   :  { %vm44_vm1 = vcmp.eq.s32.totalorder %v37_v4, 0  ;;  %p102_p2 = pnand %p100_p1, %p97_p0 }
   0x7   :  { %v50_v7 = vsel %vm44_vm1, %v12_v2, 0.0 }
  0x23   :  { %45 = vadd.xlane.f32.xlu0 %v12_v2 }
  0x83   :  { %v42_v5 = vpop.permute.xlu0 %41 }
  0x84   :  { %vm43_vm0 = vcmp.eq.s32.totalorder %v37_v4, %v42_v5 }
  0x85   :  { %v47_v6 = vsel %vm43_vm0, %v12_v2, 0.0 }
  0x86   :  { %48 = vadd.xlane.f32.xlu1 %v47_v6 }
  0x8a   :  { %51 = vadd.xlane.f32.xlu1 %v50_v7 }
  0x8e   :  { %23 = vadd.xlane.f32.xlu1 %v22_v10 }
  0xb0   :  { %v46_v11 = vpop.xlane.xlu0 %45 }
 0x113   :  { %v49_v12 = vpop.xlane.xlu1 %48 }
 0x114   :  { %v54_v13 = vsub.f32 %v46_v11, %v49_v12  ;;  %v53_v16 = vmul.f32 0.9, %v49_v12 }
 0x117   :  { %v52_v14 = vpop.xlane.xlu1 %51 }
 0x118   :  { %v55_v15 = vsub.f32 %v54_v13, %v52_v14 }
 0x11a   :  { %v56_v17 = vmul.f32 0.007142857, %v55_v15 }
 0x11b   :  { %v24_v18 = vpop.xlane.xlu1 %23 }
 0x11c   :  { %v57_v19 = vadd.f32 %v56_v17, %v53_v16  ;;  %v25_v20 = vrot.slane %v24_v18, 4 }
 0x11e   :  { %v59_v21 = vmul.f32 %v87_v9, %v57_v19  ;;  %v26_v22 = vadd.f32 %v25_v20, %v24_v18 }
 0x120   :  { %v61_v23 = vsel %vm21_vm3, %v59_v21, 0.0  ;;  %v27_v24 = vrot.slane %v26_v22, 2 }
 0x121   :  { %62 = vadd.xlane.f32.xlu1 %v61_v23 }
 0x122   :  { %v28_v25 = vadd.f32 %v27_v24, %v26_v22 }
 0x124   :  { %v29_v26 = vrot.slane %v28_v25, 1 }
 0x126   :  { %v30_v27 = vadd.f32 %v29_v26, %v28_v25 }
 0x128   :  { %88 = vpush %v30_v27 }
 0x159   :  { %s89_s0 = spop %88 }
 0x15a   :  { %s32_s1 = smul.f32 -0.5889887, %s89_s0 }
 0x1ae   :  { %v63_v28 = vpop.xlane.xlu1 %62 }
 0x1af   :  { %v64_v29 = vrot.slane %v63_v28, 4 }
 0x1b1   :  { %v65_v30 = vadd.f32 %v64_v29, %v63_v28 }
 0x1b3   :  { %v66_v31 = vrot.slane %v65_v30, 2 }
 0x1b5   :  { %v67_v32 = vadd.f32 %v66_v31, %v65_v30 }
 0x1b7   :  { %v68_v33 = vrot.slane %v67_v32, 1 }
 0x1b9   :  { %v69_v34 = vadd.f32 %v68_v33, %v67_v32 }
 0x1bb   :  { %90 = vpush %v69_v34 }
 0x1ec   :  { %s91_s13 = spop %90 }
 0x1ed   :  { %s71_s14 = ssub.f32 %s32_s1, %s91_s13 }
 0x1ef   :  { %73 = sst [smem:[#allocation2]] %s71_s14 }
 0x1f0   :  { %105 = shalt.err (!%p102_p2)
}
 0x1f1   :  { %s110_s22 = smov [#allocation2]  }
 0x1f2   :  { %81 = dma.smem_to_hbm %s110_s22, 16, %s148_s2, [#allocation3]  }
 0x1f3   :  { %106 = dma.done.wait [#allocation3], 16  }
 0x1f4   :  { %107 = vsyncadd [#allocation3], 4294967280 }
 0x1f5   :  { %85 = sfence }
 0x1f6   :  { %86 = vsyncpa [#allocation3], 1 }

</bundles_post_ra>
